<compile_context>
chip_gen: v7x
topology: tpu7x:2x2x1
jax: 0.10.0
libtpu: 0.0.40
codegen_flags: <defaults>
</compile_context>

<pallas_src>
import jax
import jax.numpy as jnp
from jax.experimental import pallas as pl
from jax.experimental.pallas import tpu as pltpu


# -----------------------------------------------------------------------------
# Pallas kernel: the GFM hot path on lane-packed features
# -----------------------------------------------------------------------------
def _gfm_kernel(b_ref, p_ref, v_ref, wp_ref, wv_ref, fuse_ref):
    """Gated fusion on lane-packed features.

    p_ref / v_ref : [tile_rows, width]   pack points per row (lane-dense)
    wp_ref, wv_ref: [width, width] bf16  block-diagonal logit-diff weights with
                                         the 0/1 lane-expansion already folded in
    b_ref         : [1] (SMEM)           combined bias difference
    """
    pf = p_ref[...]
    vf = v_ref[...]

    # logit difference l0 - l1 ; softmax([l0,l1])[:,0] == sigmoid(l0 - l1).
    # bf16 operands for the MXU, f32 accumulation.
    logit = (
        jnp.dot(pf.astype(jnp.bfloat16), wp_ref[...],
                preferred_element_type=jnp.float32)
        + jnp.dot(vf.astype(jnp.bfloat16), wv_ref[...],
                  preferred_element_type=jnp.float32)
        + b_ref[0]
    )                                      # [tile_rows, width], per-point gate
    g = jax.nn.sigmoid(logit)              # already broadcast across each point's lanes

    pf32 = pf.astype(jnp.float32)
    vf32 = vf.astype(jnp.float32)
    # fuse = p * g + v * (1 - g) = v + g * (p - v)   (f32 elementwise)
    fuse_ref[...] = (vf32 + g * (pf32 - vf32)).astype(fuse_ref.dtype)


def gfm_fuse(p_feats, v2p_feats, wp, bp, wv, bv, *, tile_rows=4096):
    """Run the fused GFM gate over point features.

    p_feats  : [N, C]  point features (p.F)
    v2p_feats: [N, C]  voxel features gathered to points (voxel_to_point(v, p))
    wp, wv   : [C, 2]  linear weights (already transposed vs. torch's [2, C])
    bp, bv   : [1, 2]  biases
    """
    N, C = p_feats.shape
    dtype = p_feats.dtype

    # --- lane-dense channel guard: width of one point's lanes must divide 128
    if C >= 128:
        Cp = -(-C // 128) * 128
    else:
        Cp = 1
        while Cp < C or 128 % Cp != 0:
            Cp *= 2
    if Cp != C:
        # Fallback path only (odd channel counts): copies inputs once.
        p_feats = jnp.pad(p_feats, ((0, 0), (0, Cp - C)))
        v2p_feats = jnp.pad(v2p_feats, ((0, 0), (0, Cp - C)))
        wp = jnp.pad(wp, ((0, Cp - C), (0, 0)))
        wv = jnp.pad(wv, ((0, Cp - C), (0, 0)))
    pack = max(1, 128 // Cp)
    width = pack * Cp

    # --- pad point count only to a multiple of `pack` (<= pack-1 rows) --------
    rem = (-N) % pack
    Np = N + rem
    if rem:
        p_feats = jnp.pad(p_feats, ((0, rem), (0, 0)))
        v2p_feats = jnp.pad(v2p_feats, ((0, rem), (0, 0)))
    rows = Np // pack
    # Contiguous row merge: free reshape (no HBM copy).
    p_packed = p_feats.reshape(rows, width)
    v_packed = v2p_feats.reshape(rows, width)

    # --- logit-difference reparameterisation of the 2-way softmax, with the
    #     lane-expansion folded into the weights: Wexp[i, l] = w_diff[i % Cp]
    #     when i and l belong to the same packed point, else 0.
    w_diff_p = (wp[:, 0] - wp[:, 1]).astype(jnp.float32)            # [Cp]
    w_diff_v = (wv[:, 0] - wv[:, 1]).astype(jnp.float32)            # [Cp]
    b_diff = jnp.reshape(
        (bp[..., 0] - bp[..., 1]) + (bv[..., 0] - bv[..., 1]), (1,)
    ).astype(jnp.float32)

    lane_blk = jnp.arange(width, dtype=jnp.int32) // Cp
    same_blk = (lane_blk[:, None] == lane_blk[None, :]).astype(jnp.float32)
    wp_exp = (same_blk * jnp.tile(w_diff_p, pack)[:, None]).astype(jnp.bfloat16)
    wv_exp = (same_blk * jnp.tile(w_diff_v, pack)[:, None]).astype(jnp.bfloat16)

    # --- tile selection: cdiv grid, partial last tile, >= 2 tiles for v7x -----
    # tile_rows=4096 -> 2 MiB f32 blocks, 12 MiB double-buffered: fits v5e's
    # 16 MiB scoped VMEM and v7x's 64 MiB physical; bump to 8192 on v6e only.
    rows_r8 = (rows + 7) // 8 * 8
    tile_rows = min(max(8, (tile_rows // 8) * 8), rows_r8)
    if rows_r8 > 8 and tile_rows >= rows_r8:
        # Split into (at least) two grid steps so both v7x TensorCores get work.
        tile_rows = max(8, ((rows_r8 // 2) + 7) // 8 * 8)
    grid = (pl.cdiv(rows, tile_rows),)

    feat_spec = pl.BlockSpec((tile_rows, width), lambda i: (i, 0))
    w_spec = pl.BlockSpec((width, width), lambda i: (0, 0))
    b_spec = pl.BlockSpec(memory_space=pltpu.MemorySpace.SMEM)

    bytes_per_el = jnp.dtype(dtype).itemsize
    cost = pl.CostEstimate(
        flops=rows * (4 * width * width + 4 * width),
        transcendentals=rows * width,
        bytes_accessed=3 * rows * width * bytes_per_el + 2 * width * width * 2,
    )

    fused = pl.pallas_call(
        _gfm_kernel,
        out_shape=jax.ShapeDtypeStruct((rows, width), dtype),
        grid_spec=pltpu.PrefetchScalarGridSpec(
            num_scalar_prefetch=0,
            grid=grid,
            in_specs=[b_spec, feat_spec, feat_spec, w_spec, w_spec],
            out_specs=feat_spec,
        ),
        compiler_params=pltpu.CompilerParams(
            dimension_semantics=("parallel",),
            vmem_limit_bytes=32 * 1024 * 1024,
        ),
        cost_estimate=cost,
    )(b_diff, p_packed, v_packed, wp_exp, wv_exp)

    fused = fused.reshape(Np, Cp)           # free reshape back to per-point rows
    if Np != N or Cp != C:
        fused = fused[:N, :C]               # only on the ragged/odd-C fallback path
    return fused


# -----------------------------------------------------------------------------
# Sparse-tensor glue (plain JAX): voxel_to_point gather, point_to_voxel scatter
# -----------------------------------------------------------------------------
def voxel_to_point(v_feats, p2v_idx):
    # Each point reads the feature of the voxel it falls into (nearest mapping).
    # TODO(synk): fuse this gather into the Pallas kernel (scalar-prefetched
    # p2v_idx + in-kernel gather / DMA) to avoid materializing v2p in HBM.
    return jnp.take(v_feats, p2v_idx, axis=0)


def point_to_voxel(p_feats, p2v_idx, num_voxels):
    # Scatter-mean of point features into their voxels (torchsparse point_to_voxel).
    sums = jax.ops.segment_sum(p_feats, p2v_idx, num_segments=num_voxels)
    cnts = jax.ops.segment_sum(
        jnp.ones((p_feats.shape[0], 1), p_feats.dtype), p2v_idx,
        num_segments=num_voxels)
    return sums / jnp.maximum(cnts, 1.0)


def gfm_forward(p_feats, v_feats, p2v_idx, params):
    """Full GFM.forward: returns (new point features, new voxel features)."""
    v2p = voxel_to_point(v_feats, p2v_idx)
    fuse = gfm_fuse(p_feats, v2p,
                    params["wp"], params["bp"], params["wv"], params["bv"])
    v_new = point_to_voxel(fuse, p2v_idx, v_feats.shape[0])
    return fuse, v_new


# -----------------------------------------------------------------------------
# Driver
# -----------------------------------------------------------------------------
if __name__ == "__main__":
    def run_case(key, N, C, V):
        k_p, k_v, k_idx, k_wp, k_bp, k_wv, k_bv = jax.random.split(key, 7)
        p_feats = jax.random.normal(k_p, (N, C), dtype=jnp.float32)
        v_feats = jax.random.normal(k_v, (V, C), dtype=jnp.float32)
        p2v_idx = jax.random.randint(k_idx, (N,), 0, V, dtype=jnp.int32)

        # Synthetic parameters for the two nn.Linear(C, 2) branches, stored
        # pre-transposed as [C, 2] so the math is x @ W + b.
        bound = 1.0 / jnp.sqrt(jnp.float32(C))
        params = {
            "wp": jax.random.uniform(k_wp, (C, 2), jnp.float32, -bound, bound),
            "bp": jax.random.uniform(k_bp, (1, 2), jnp.float32, -bound, bound),
            "wv": jax.random.uniform(k_wv, (C, 2), jnp.float32, -bound, bound),
            "bv": jax.random.uniform(k_bv, (1, 2), jnp.float32, -bound, bound),
        }

        fuse, v_new = gfm_forward(p_feats, v_feats, p2v_idx, params)
        jax.block_until_ready((fuse, v_new))

        # Reference check in plain JAX (same math as the PyTorch forward).
        v2p = voxel_to_point(v_feats, p2v_idx)
        logits = (p_feats @ params["wp"] + params["bp"]
                  + v2p @ params["wv"] + params["bv"])
        gate = jax.nn.softmax(logits, axis=-1)
        fuse_ref = p_feats * gate[:, 0:1] + v2p * gate[:, 1:2]
        # Gate matmuls use bf16 MXU operands -> loose tolerance vs f32 reference.
        assert jnp.allclose(fuse, fuse_ref, atol=5e-2, rtol=5e-2), "fuse mismatch"

        v_ref = point_to_voxel(fuse_ref, p2v_idx, V)
        assert jnp.allclose(v_new, v_ref, atol=5e-2, rtol=5e-2), "voxel mismatch"

    key = jax.random.PRNGKey(0)
    k1, k2 = jax.random.split(key)
    run_case(k1, N=200, C=32, V=24)   # lane-packed fast path (zero host-side copies)
    run_case(k2, N=203, C=48, V=17)   # ragged tail + odd-channel fallback path
    print("KERNEL_OK")
</pallas_src>

<mosaic_0001>
module attributes {stable_mosaic.version = 11 : i64} {
  func.func @_gfm_kernel(%arg0: i32, %arg1: memref<1xf32, #tpu.memory_space<smem>>, %arg2: memref<32x128xf32, #tpu.memory_space<vmem>>, %arg3: memref<32x128xf32, #tpu.memory_space<vmem>>, %arg4: memref<128x128xbf16, #tpu.memory_space<vmem>>, %arg5: memref<128x128xbf16, #tpu.memory_space<vmem>>, %arg6: memref<32x128xf32, #tpu.memory_space<vmem>>) attributes {dimension_semantics = [#tpu.dimension_semantics<parallel>], iteration_bounds = array<i64: 2>, scalar_prefetch = 0 : i64, scratch_operands = 0 : i64, tpu.core_type = #tpu.core_type<tc>, window_params = [{transform_indices = @transform_0, window_bounds = array<i64: 1>}, {transform_indices = @transform_1, window_bounds = array<i64: 32, 128>}, {transform_indices = @transform_2, window_bounds = array<i64: 32, 128>}, {pipeline_mode = #tpu.pipeline_mode<synchronous>, transform_indices = @transform_3, window_bounds = array<i64: 128, 128>}, {pipeline_mode = #tpu.pipeline_mode<synchronous>, transform_indices = @transform_4, window_bounds = array<i64: 128, 128>}, {transform_indices = @transform_5, window_bounds = array<i64: 32, 128>}]} {
    %c0 = arith.constant 0 : index
    %c0_0 = arith.constant 0 : index
    %0 = vector.load %arg2[%c0, %c0_0] : memref<32x128xf32, #tpu.memory_space<vmem>>, vector<32x128xf32>
    %c0_1 = arith.constant 0 : index
    %c0_2 = arith.constant 0 : index
    %1 = vector.load %arg3[%c0_1, %c0_2] : memref<32x128xf32, #tpu.memory_space<vmem>>, vector<32x128xf32>
    %2 = arith.truncf %0 : vector<32x128xf32> to vector<32x128xbf16>
    %c0_3 = arith.constant 0 : index
    %c0_4 = arith.constant 0 : index
    %3 = vector.load %arg4[%c0_3, %c0_4] : memref<128x128xbf16, #tpu.memory_space<vmem>>, vector<128x128xbf16>
    %cst = arith.constant dense<0.000000e+00> : vector<32x128xf32>
    %4 = tpu.matmul %2, %3, %cst {dimension_numbers = #tpu.dot_dimension_numbers<[1], [0], [0], [1], [0, 0, 1, 1], [], []>} : vector<32x128xbf16>, vector<128x128xbf16>, vector<32x128xf32> -> vector<32x128xf32>
    %5 = arith.truncf %1 : vector<32x128xf32> to vector<32x128xbf16>
    %c0_5 = arith.constant 0 : index
    %c0_6 = arith.constant 0 : index
    %6 = vector.load %arg5[%c0_5, %c0_6] : memref<128x128xbf16, #tpu.memory_space<vmem>>, vector<128x128xbf16>
    %cst_7 = arith.constant dense<0.000000e+00> : vector<32x128xf32>
    %7 = tpu.matmul %5, %6, %cst_7 {dimension_numbers = #tpu.dot_dimension_numbers<[1], [0], [0], [1], [0, 0, 1, 1], [], []>} : vector<32x128xbf16>, vector<128x128xbf16>, vector<32x128xf32> -> vector<32x128xf32>
    %8 = arith.addf %4, %7 : vector<32x128xf32>
    %c0_8 = arith.constant 0 : index
    %9 = memref.load %arg1[%c0_8] : memref<1xf32, #tpu.memory_space<smem>>
    %10 = vector.broadcast %9 : f32 to vector<32x128xf32>
    %11 = arith.addf %8, %10 : vector<32x128xf32>
    %12 = arith.negf %11 : vector<32x128xf32>
    %13 = math.exp %12 : vector<32x128xf32>
    %cst_9 = arith.constant 1.000000e+00 : f32
    %14 = vector.broadcast %cst_9 : f32 to vector<32x128xf32>
    %15 = arith.addf %14, %13 : vector<32x128xf32>
    %16 = arith.divf %14, %15 : vector<32x128xf32>
    %17 = arith.subf %0, %1 : vector<32x128xf32>
    %18 = arith.mulf %16, %17 : vector<32x128xf32>
    %19 = arith.addf %1, %18 : vector<32x128xf32>
    %c0_10 = arith.constant 0 : index
    %c0_11 = arith.constant 0 : index
    %20 = vector.load %arg6[%c0_10, %c0_11] : memref<32x128xf32, #tpu.memory_space<vmem>>, vector<32x128xf32>
    tpu.vector_store %arg6[%c0_10, %c0_11], %19 {strides = array<i32>} : memref<32x128xf32, #tpu.memory_space<vmem>>, vector<32x128xf32>,
    return
  }
  func.func @transform_0(%arg0: i32) -> i32 {
    %c0_i32 = arith.constant 0 : i32
    %c0_i32_0 = arith.constant 0 : i32
    return %c0_i32 : i32
  }
  func.func @transform_1(%arg0: i32) -> (i32, i32) {
    %c0_i32 = arith.constant 0 : i32
    %c0_i32_0 = arith.constant 0 : i32
    return %arg0, %c0_i32 : i32, i32
  }
  func.func @transform_2(%arg0: i32) -> (i32, i32) {
    %c0_i32 = arith.constant 0 : i32
    %c0_i32_0 = arith.constant 0 : i32
    return %arg0, %c0_i32 : i32, i32
  }
  func.func @transform_3(%arg0: i32) -> (i32, i32) {
    %c0_i32 = arith.constant 0 : i32
    %c0_i32_0 = arith.constant 0 : i32
    %c0_i32_1 = arith.constant 0 : i32
    return %c0_i32, %c0_i32_0 : i32, i32
  }
  func.func @transform_4(%arg0: i32) -> (i32, i32) {
    %c0_i32 = arith.constant 0 : i32
    %c0_i32_0 = arith.constant 0 : i32
    %c0_i32_1 = arith.constant 0 : i32
    return %c0_i32, %c0_i32_0 : i32, i32
  }
  func.func @transform_5(%arg0: i32) -> (i32, i32) {
    %c0_i32 = arith.constant 0 : i32
    %c0_i32_0 = arith.constant 0 : i32
    return %arg0, %c0_i32 : i32, i32
  }
}

</mosaic_0001>

<bundles_post_ra>
// kernel: tpu_custom_call.1
= control target key start
LH: loop header
LB: loop body
LE: loop exit
PB: predicated region body
PF: predicated region fallthrough
CT: control target
= control target key end

     0   :  { %s1559_s0 = inlined_call_operand.<no memory space> [shape: f32[1], index: 0, kind: input, shape index: {}]   ;;  %s1560_s1 = inlined_call_operand.hbm [shape: f32[50,128], index: 1, kind: input, shape index: {}]   ;;  %s1561_s2 = inlined_call_operand.hbm [shape: f32[50,128], index: 2, kind: input, shape index: {}]   ;;  %s1562_s3 = inlined_call_operand.hbm [shape: bf16[128,128], index: 3, kind: input, shape index: {}]   ;;  %s1563_s4 = inlined_call_operand.hbm [shape: bf16[128,128], index: 4, kind: input, shape index: {}]   ;;  %s1564_s5 = inlined_call_operand.hbm [shape: f32[50,128], index: 5, kind: output, shape index: {}]  }
   0x1   :  { %10 = sst [smem:[#allocation2]] %s1559_s0 }
   0x2   :  { %11 = vsyncpa [#allocation4], 0 }
   0x3   :  { %13 = vsyncpa [#allocation4 + $0x1], 0 }
   0x4   :  { %14 = vsyncpa [#allocation7], 0 }
   0x5   :  { %16 = vsyncpa [#allocation7 + $0x1], 0 }
   0x6   :  { %17 = vsyncpa [#allocation10], 0 }
   0x7   :  { %18 = vsyncpa [#allocation5], 0 }
   0x8   :  { %20 = vsyncpa [#allocation5 + $0x1], 0  ;;  %s1220_s20 = smov 0   ;;  %s1222_s21 = smov 0  }
   0x9   :  { %s1224_s22 = smov 0   ;;  %s1226_s23 = smov 0  }
   0xa LB: > { %s1241_s0 = sadd.s32 4294967295, %s1172_s23   ;;  %s760_s24 = sadd.s32 4294967294, %s1172_s23   ;;  %s1172_s23 = sphi %s1226_s23, %s1587_s23   ;;  %s1168_s22 = sphi %s1224_s22, %s1586_s22   ;;  %s1164_s21 = sphi %s1222_s21, %s1585_s21   ;;  %s1160_s20 = sphi %s1220_s20, %s1584_s20  }
   0xb   : > { %s1245_s25 = sadd.s32 1, %s1172_s23   ;;  %s54_s26 = sadd.s32 1, %s1168_s22 }
   0xc   : > { %s51_s27 = ssub.s32 %s1172_s23, %s1245_s25  ;;  %p61_p0 = scmp.ne.s32.totalorder %s1168_s22, %s1164_s21 }
   0xd   : > { %p52_p1 = scmp.eq.s32.totalorder %s51_s27, 0  ;;  %p62_p2 = scmp.eq.s32.totalorder %s1172_s23, 0 }
   0xe   : > { %p67_p3 = scmp.ne.s32.totalorder %s1164_s21, %s1160_s20  ;;  %p1565_p4 = scmp.eq.s32.totalorder %s1241_s0, 0 }
   0xf   : > { %s1257_s28 = scalar_select %p52_p1, %s1168_s22, %s54_s26  }
  0x10   : > { %p1259_p5 = por %p62_p2, %p61_p0  ;;  %p1265_p6 = por %p1565_p4, %p67_p3 }
  0x11   : > { %p159_p7 = scmp.eq.s32.totalorder %s1241_s0, 1  ;;  %p165_p8 = scmp.eq.s32.totalorder %s760_s24, 1 }
  0x12   : > { %s1568_s29 = scalar_select %p1259_p5, 1, 0 }
  0x13   : > { %s1569_s30 = scalar_select %p1265_p6, 1, 0 }
  0x14   : > { %p761_p9 = scmp.ge.s32.totalorder %s1172_s23, 1  ;;  %p172_p10 = scmp.lt.s32.totalorder %s1172_s23, 3 }
  0x15   : > { %p1272_p11 = por %p159_p7, %p61_p0  ;;  %p1276_p12 = por %p165_p8, %p67_p3 }
  0x16   : > { %p1280_p13 = pnand %p761_p9, %p172_p10  ;;  %s1174_s9 = smov [#allocation8]  }
  0x17   : > { %s1570_s6 = scalar_select %p1272_p11, 1, 0 }
  0x18   : > { %s1571_s7 = scalar_select %p1276_p12, 1, 0 }
  0x19   : > { %s1572_s8 = scalar_select %p1280_p13, 1, 0 }
  0x1a   : > { %p892_p1 = pneg %p1280_p13  ;;  %s187_s10 = sshll.u32 %s1174_s9, 4  ;;  %s188_s10 = int_to_ptr.vmem [resolvable:$true] %s187_s10 }
  0x1b   : > { %s1175_s12 = smov [#allocation9]   ;;  %s982_s16 = scalar_lea.hbm %s1562_s3, 1024 }
  0x1c   : > { %p1288_p2 = pnand %p892_p1, %p1565_p4  ;;  %s200_s13 = sshll.u32 %s1175_s12, 4  ;;  %s1292_s13 = int_to_ptr.vmem [resolvable:$true] %s200_s13 }
  0x1d   : > { %p983_p0 = scmp.ne.s32.totalorder %s1562_s3, %s982_s16  ;;  %p989_p9 = scmp.lt.u32.totalorder %s982_s16, %s1562_s3 }
  0x1e   : > { %p984_p3 = pneg %p1288_p2 }
  0x20   : > { %p985_p7 = pnand %p984_p3, %p983_p0 }
  0x22   : > { %p986_p8 = pneg %p985_p7 }
  0x24   : > { %p991_p10 = pnand %p989_p9, %p986_p8 }
  0x26   : > { %994 = shalt.err (!%p991_p10)
}
  0x27   : > { %s995_s26 = scalar_lea.vmem %s188_s10, 1024  ;;  %p1003_p11 = scmp.lt.s32.totalorder %s188_s10, %s188_s10 }
  0x28   : > { %p996_p1 = scmp.ne.s32.totalorder %s188_s10, %s995_s26  ;;  %p1004_p6 = scmp.lt.s32.totalorder %s995_s26, %s995_s26 }
  0x2a   : > { %p998_p4 = pnand %p996_p1, %p984_p3  ;;  %p1005_p13 = por %p1004_p6, %p1003_p11 }
  0x2c   : > { %p999_p12 = pneg %p998_p4 }
  0x2e   : > { %p1006_p5 = pnand %p1005_p13, %p999_p12 }
  0x30   : > { %1009 = shalt.err (!%p1006_p5)
}
  0x31   : > { %s1176_s27 = smov 64   ;;  %s1177_s9 = smov 4  }
  0x32   : > { %895 = dma.hbm_to_vmem [thread:$0]  (!%p1288_p2), %s1562_s3, 1024, %s188_s10, [#allocation7], %s1176_s27, %s1176_s27, %s1177_s9  }
  0x33   : > { %s1010_s17 = scalar_lea.hbm %s1563_s4, 1024 }
  0x34   : > { %p1011_p4 = scmp.ne.s32.totalorder %s1563_s4, %s1010_s17  ;;  %p1017_p11 = scmp.lt.u32.totalorder %s1010_s17, %s1563_s4 }
  0x36   : > { %p1013_p5 = pnand %p1011_p4, %p984_p3 }
  0x38   : > { %p1014_p6 = pneg %p1013_p5 }
  0x3a   : > { %p1019_p12 = pnand %p1017_p11, %p1014_p6 }
  0x3c   : > { %1022 = shalt.err (!%p1019_p12)
}
  0x3d   : > { %s1023_s10 = scalar_lea.vmem %s1292_s13, 1024  ;;  %p1031_p8 = scmp.lt.s32.totalorder %s1292_s13, %s1292_s13 }
  0x3e   : > { %p1024_p13 = scmp.ne.s32.totalorder %s1292_s13, %s1023_s10  ;;  %p1032_p9 = scmp.lt.s32.totalorder %s1023_s10, %s1023_s10 }
  0x40   : > { %p1026_p0 = pnand %p1024_p13, %p984_p3  ;;  %p1033_p10 = por %p1032_p9, %p1031_p8 }
  0x42   : > { %p1027_p7 = pneg %p1026_p0 }
  0x44   : > { %p1034_p1 = pnand %p1033_p10, %p1027_p7 }
  0x46   : > { %1037 = shalt.err (!%p1034_p1)
}
  0x47   : > { %898 = dma.hbm_to_vmem [thread:$0]  (!%p1288_p2), %s1563_s4, 1024, %s1292_s13, [#allocation10], %s1176_s27, %s1176_s27, %s1177_s9  }
  0x48   : > { %p764_p4 = scmp.ge.s32.totalorder %s1172_s23, 2 }
  0x49   : > { %p1574_p3 = scmp.ne.s32.totalorder (!%p764_p4), %s1568_s29, 0 }
  0x4a   : > { %210 = sbr.rel (%p764_p4) target bundleno = 153 (0x99), region = 28 }
  0x51   : > { %213 = sbr.rel (!%p1574_p3) target bundleno = 116 (0x74), region = 32  ;;  %s214_s15 = sand.u32 (%p1574_p3), 1, %s1168_s22  }
  0x52   : > { %s766_s16 = sshll.u32 (%p1574_p3), %s1172_s23, 2  ;;  %s765_s17 = sshll.u32 (%p1574_p3), %s214_s15, 5 }
  0x53   : > { %s220_s18 = ssub.s32 (%p1574_p3), 7, %s766_s16  ;;  %s1351_s27 = scalar_lea.sflag (%p1574_p3), [#allocation4], %s214_s15 }
  0x54   : > { %p221_p5 = scmp.lt.s32.totalorder (%p1574_p3), %s220_s18, 4  ;;  %s218_s9 = scalar_lea.vmem (%p1574_p3), [#allocation3], %s765_s17 }
  0x58   : > { %s1589_s18 = smov (!%p221_p5, %s220_s18), 4 }
  0x59   : > { %s1348_s11 = sshll.u32 %s1589_s18, 7 }
  0x5a   : > { %s225_s13 = ssub.s32 512, %s1348_s11 }
  0x5b   : > { %226 = vsyncadd %s1351_s27, %s225_s13  ;;  %p768_p2 = scmp.ne.s32.totalorder %s1348_s11, 0  ;;  %s814_s19 = sshll.u32 %s1172_s23, 9 }
  0x5c   : > { %s1359_s10 = scalar_lea.hbm %s1560_s1, %s814_s19  ;;  %s231_s12 = sshll.u32 %s218_s9, 4  ;;  %s1361_s12 = int_to_ptr.vmem [resolvable:$true] %s231_s12 }
  0x5d   : > { %s1038_s14 = scalar_lea.hbm %s1359_s10, %s1348_s11  ;;  %s1042_s17 = scalar_lea.hbm %s1560_s1, 896 }
  0x5e   : > { %p1039_p6 = scmp.ne.s32.totalorder %s1359_s10, %s1038_s14  ;;  %p1043_p13 = scmp.lt.u32.totalorder %s1359_s10, %s1560_s1 }
  0x5f   : > { %p1044_p0 = scmp.lt.u32.totalorder %s1042_s17, %s1038_s14  ;;  %p1046_p8 = scmp.lt.u32.totalorder %s1038_s14, %s1359_s10 }
  0x60   : > { %p1040_p11 = pnand %p1039_p6, %p768_p2 }
  0x61   : > { %p1045_p7 = por %p1044_p0, %p1043_p13 }
  0x62   : > { %p1041_p12 = pneg %p1040_p11 }
  0x63   : > { %p1047_p9 = por %p1046_p8, %p1045_p7 }
  0x65   : > { %p1048_p10 = pnand %p1047_p9, %p1041_p12 }
  0x67   : > { %1051 = shalt.err (!%p1048_p10)
}
  0x68   : > { %s1052_s9 = scalar_lea.vmem %s1361_s12, %s1348_s11  ;;  %s1178_s19 = smov [#allocation3]  }
  0x69   : > { %p1053_p1 = scmp.ne.s32.totalorder %s1361_s12, %s1052_s9  ;;  %s1056_s24 = sshll.u32 %s1178_s19, 4  ;;  %s1057_s24 = int_to_ptr.vmem [resolvable:$false] %s1056_s24 }
  0x6a   : > { %s1058_s26 = scalar_lea.vmem %s1057_s24, 1024  ;;  %p1059_p6 = scmp.lt.s32.totalorder %s1361_s12, %s1057_s24 }
  0x6b   : > { %p1054_p3 = pnand %p1053_p1, %p768_p2  ;;  %p1060_p11 = scmp.lt.s32.totalorder %s1058_s26, %s1052_s9 }
  0x6d   : > { %p1055_p5 = pneg %p1054_p3  ;;  %p1061_p13 = por %p1060_p11, %p1059_p6 }
  0x6f   : > { %p1062_p0 = pnand %p1061_p13, %p1055_p5 }
  0x71   : > { %1065 = shalt.err (!%p1062_p0)
}
  0x72   : > { %s1179_s14 = smov 128   ;;  %s1180_s15 = smov 8  }
  0x73   : > { %237 = dma.hbm_to_vmem [thread:$0]  (%p768_p2), %s1359_s10, %s1348_s11, %s1361_s12, %s1351_s27, %s1179_s14, %s1179_s14, %s1180_s15  }
  0x74 PF: > { %p1575_p12 = scmp.ne.s32.totalorder %s1568_s29, 0 }
  0x75   : > { %s241_s16 = sand.u32 (%p1575_p12), 1, %s1172_s23   ;;  %s243_s17 = sand.u32 (%p1575_p12), 1, %s1168_s22  }
  0x76   : > { %240 = sbr.rel (!%p1575_p12) target bundleno = 153 (0x99), region = 36  ;;  %s772_s18 = sshll.u32 (%p1575_p12), %s243_s17, 5 }
  0x77   : > { %s773_s13 = sshll.u32 (%p1575_p12), %s1172_s23, 2  ;;  %s1396_s26 = scalar_lea.sflag (%p1575_p12), [#allocation7], %s241_s16 }
  0x78   : > { %s247_s9 = ssub.s32 (%p1575_p12), 7, %s773_s13  ;;  %s245_s11 = scalar_lea.vmem (%p1575_p12), [#allocation6], %s772_s18 }
  0x79   : > { %p248_p7 = scmp.lt.s32.totalorder (%p1575_p12), %s247_s9, 4 }
  0x7d   : > { %s1591_s9 = smov (!%p248_p7, %s247_s9), 4 }
  0x7e   : > { %s1393_s19 = sshll.u32 %s1591_s9, 7 }
  0x7f   : > { %s252_s24 = ssub.s32 512, %s1393_s19 }
  0x80   : > { %253 = vsyncadd %s1396_s26, %s252_s24  ;;  %p775_p2 = scmp.ne.s32.totalorder %s1393_s19, 0  ;;  %s815_s29 = sshll.u32 %s1172_s23, 9 }
  0x81   : > { %s1404_s12 = scalar_lea.hbm %s1561_s2, %s815_s29  ;;  %s258_s14 = sshll.u32 %s245_s11, 4  ;;  %s1406_s14 = int_to_ptr.vmem [resolvable:$true] %s258_s14 }
  0x82   : > { %s1066_s15 = scalar_lea.hbm %s1404_s12, %s1393_s19  ;;  %s1070_s18 = scalar_lea.hbm %s1561_s2, 896 }
  0x83   : > { %p1067_p8 = scmp.ne.s32.totalorder %s1404_s12, %s1066_s15  ;;  %p1071_p1 = scmp.lt.u32.totalorder %s1404_s12, %s1561_s2 }
  0x84   : > { %p1072_p3 = scmp.lt.u32.totalorder %s1070_s18, %s1066_s15  ;;  %p1074_p6 = scmp.lt.u32.totalorder %s1066_s15, %s1404_s12 }
  0x85   : > { %p1068_p9 = pnand %p1067_p8, %p775_p2 }
  0x86   : > { %p1073_p5 = por %p1072_p3, %p1071_p1 }
  0x87   : > { %p1069_p10 = pneg %p1068_p9 }
  0x88   : > { %p1075_p11 = por %p1074_p6, %p1073_p5 }
  0x8a   : > { %p1076_p13 = pnand %p1075_p11, %p1069_p10 }
  0x8c   : > { %1079 = shalt.err (!%p1076_p13)
}
  0x8d   : > { %s1080_s24 = scalar_lea.vmem %s1406_s14, %s1393_s19  ;;  %s1181_s11 = smov [#allocation6]  }
  0x8e   : > { %p1081_p0 = scmp.ne.s32.totalorder %s1406_s14, %s1080_s24  ;;  %s1084_s29 = sshll.u32 %s1181_s11, 4  ;;  %s1085_s29 = int_to_ptr.vmem [resolvable:$false] %s1084_s29 }
  0x8f   : > { %s1086_s27 = scalar_lea.vmem %s1085_s29, 1024  ;;  %p1087_p8 = scmp.lt.s32.totalorder %s1406_s14, %s1085_s29 }
  0x90   : > { %p1082_p12 = pnand %p1081_p0, %p775_p2  ;;  %p1088_p9 = scmp.lt.s32.totalorder %s1086_s27, %s1080_s24 }
  0x92   : > { %p1083_p7 = pneg %p1082_p12  ;;  %p1089_p1 = por %p1088_p9, %p1087_p8 }
  0x94   : > { %p1090_p3 = pnand %p1089_p1, %p1083_p7 }
  0x96   : > { %1093 = shalt.err (!%p1090_p3)
}
  0x97   : > { %s1182_s10 = smov 128   ;;  %s1183_s15 = smov 8  }
  0x98   : > { %264 = dma.hbm_to_vmem [thread:$0]  (%p775_p2), %s1404_s12, %s1393_s19, %s1406_s14, %s1396_s26, %s1182_s10, %s1182_s10, %s1183_s15  }
  0x99 PF: > { %p1576_p10 = scmp.ne.s32.totalorder %s1572_s8, 0 }
  0x9a   : > { %s1436_s16 = sand.u32 (!%p1576_p10), 1, %s1164_s21   ;;  %p1577_p5 = scmp.ne.s32.totalorder (!%p1576_p10), %s1569_s30, 0 }
  0x9b   : > { %270 = sbr.rel (%p1576_p10) target bundleno = 484 (0x1e4), region = 40  ;;  %s1439_s17 = sshll.u32 (!%p1576_p10), %s1436_s16, 5 }
  0x9c   : > { %s273_s18 = scalar_lea.sflag (!%p1576_p10), [#allocation4], %s1436_s16  ;;  %s1443_s13 = scalar_lea.vmem (!%p1576_p10), [#allocation3], %s1439_s17 }
  0xa2   : > { %1139 = dma.done.wait (%p1577_p5), %s273_s18, 512  }
  0xa3   : > { %1141 = vsyncadd (%p1577_p5), %s273_s18, 4294966784  ;;  %s281_s8 = sand.u32 1, %s1241_s0   ;;  %s1451_s26 = scalar_lea.vmem [#allocation6], %s1439_s17 }
  0xa4   : > { %s282_s19 = scalar_lea.sflag [#allocation7], %s281_s8 }
  0xa5   : > { %1143 = dma.done.wait (%p1577_p5), %s282_s19, 512  }
  0xa6   : > { %1145 = vsyncadd (%p1577_p5), %s282_s19, 4294966784  ;;  %p1578_p2 = scmp.eq.s32.totalorder %s1241_s0, 0 }
  0xa8   : > { %1147 = dma.done.wait (%p1578_p2), [#allocation7], 1024   ;;  %p1579_p6 = pmov %p1578_p2 }
  0xa9   : > { %p1580_p11 = pmov %p1578_p2 }
  0xaa   : > { %1149 = vsyncadd (%p1579_p6), [#allocation7], 4294966272 }
  0xab   : > { %1151 = dma.done.wait (%p1580_p11), [#allocation10], 1024   ;;  %p1581_p13 = pmov %p1578_p2 }
  0xac   : > { %v950_v0 = vld [vmem:[#allocation9] sm:$0xff]   ;;  %v952_v2 = vld [vmem:[#allocation9 + $0x8] sm:$0xff]   ;;  %v954_v4 = vld [vmem:[#allocation9 + $0x10] sm:$0xff]   ;;  %s579_s30 = sld [smem:[#allocation2]]  ;;  %s324_s12 = scalar_lea.vmem [#allocation11], %s1439_s17 }
  0xad   : > { %1153 = vsyncadd (%p1581_p13), [#allocation10], 4294966272  ;;  %v951_v1 = vld [vmem:[#allocation8] sm:$0xff]   ;;  %837 = vmatprep.subr.bf16.mxu1 %v950_v0  ;;  %v953_v3 = vld [vmem:[#allocation8 + $0x8] sm:$0xff]   ;;  %s626_s14 = scalar_lea.sflag [#allocation5], %s1436_s16  ;;  %p1582_p0 = scmp.ne.s32.totalorder %s1570_s6, 0 }
  0xae   : > { %857 = vmatprep.subr.bf16.mxu0 %v951_v1  ;;  %838 = vmatpush3.bf16.msra.mxu1 %v950_v0  ;;  %v955_v5 = vld [vmem:[#allocation8 + $0x10] sm:$0xff]   ;;  %v956_v6 = vld [vmem:[#allocation9 + $0x18] sm:$0xff]   ;;  %v958_v8 = vld [vmem:[#allocation9 + $0x20] sm:$0xff]   ;;  %s806_s9 = sshll.u32 (%p1582_p0), %s1241_s0, 2 }
  0xaf   : > { %858 = vmatpush3.bf16.msra.mxu0 %v951_v1  ;;  %839 = vmatprep.subr.bf16.mxu1 %v952_v2  ;;  %v957_v7 = vld [vmem:[#allocation8 + $0x18] sm:$0xff]   ;;  %v959_v9 = vld [vmem:[#allocation8 + $0x20] sm:$0xff]   ;;  %v960_v10 = vld [vmem:[#allocation9 + $0x28] sm:$0xff]   ;;  %s634_s24 = ssub.s32 (%p1582_p0), 7, %s806_s9 }
  0xb0   : > { %859 = vmatprep.subr.bf16.mxu0 %v953_v3  ;;  %v1466_v11 = vld [vmem:[%s1451_s26] sm:$0xff]  ;;  %v1469_v12 = vld [vmem:[%s1451_s26 + $0x8] sm:$0xff]  ;;  %v962_v18 = vld [vmem:[#allocation9 + $0x30] sm:$0xff]   ;;  %p635_p12 = scmp.lt.s32.totalorder (%p1582_p0), %s634_s24, 4 }
  0xb1   : > { %v1472_v13 = vld [vmem:[%s1443_s13] sm:$0xff]  ;;  %v961_v14 = vld [vmem:[#allocation8 + $0x28] sm:$0xff]   ;;  %v367_v15 = vpack.c.bf16 %v1469_v12, %v1466_v11  ;;  %v963_v19 = vld [vmem:[#allocation8 + $0x30] sm:$0xff]  }
  0xb2   : > { %840 = vmatpush3.bf16.msra.mxu1 %v952_v2  ;;  %v1477_v16 = vld [vmem:[%s1443_s13 + $0x8] sm:$0xff]  ;;  %v964_v20 = vld [vmem:[#allocation9 + $0x38] sm:$0xff]   ;;  %v347_v22 = vld [vmem:[%s1451_s26 + $0x10] sm:$0xff]  ;;  %v580_v30 = vstv %s579_s30  ;;  %v609_v58 = vsub.f32 %v1472_v13, %v1466_v11 }
  0xb3   : > { %860 = vmatpush3.bf16.msra.mxu0 %v953_v3  ;;  %841 = vmatprep.subr.bf16.mxu1 %v954_v4  ;;  %v349_v17 = vpack.c.bf16 %v1477_v16, %v1472_v13  ;;  %v965_v21 = vld [vmem:[#allocation8 + $0x38] sm:$0xff]   ;;  %v343_v24 = vld [vmem:[%s1443_s13 + $0x10] sm:$0xff]  ;;  %v610_v61 = vsub.f32 %v1477_v16, %v1469_v12 }
  0xb4   : > { %861 = vmatprep.subr.bf16.mxu0 %v955_v5  ;;  %853 = vmatprep.mubr.bf16.mxu1 %v367_v15  ;;  %v1483_v23 = vld [vmem:[%s1451_s26 + $0x18] sm:$0xff]  ;;  %v611_v57 = vsub.f32 %v343_v24, %v347_v22 }
  0xb5   : > { %873 = vmatprep.mubr.bf16.mxu0 %v349_v17  ;;  %v344_v25 = vld [vmem:[%s1443_s13 + $0x18] sm:$0xff]  ;;  %v368_v26 = vpack.c.bf16 %v1483_v23, %v347_v22 }
  0xb6   : > { %842 = vmatpush3.bf16.msra.mxu1 %v954_v4  ;;  %v350_v27 = vpack.c.bf16 %v344_v25, %v343_v24  ;;  %v612_v59 = vsub.f32 %v344_v25, %v1483_v23 }
  0xb7   : > { %862 = vmatpush3.bf16.msra.mxu0 %v955_v5  ;;  %843 = vmatprep.subr.bf16.mxu1 %v956_v6 }
  0xb8   : > { %863 = vmatprep.subr.bf16.mxu0 %v957_v7 }
  0xba   : > { %844 = vmatpush3.bf16.msra.mxu1 %v956_v6 }
  0xbb   : > { %864 = vmatpush3.bf16.msra.mxu0 %v957_v7  ;;  %845 = vmatprep.subr.bf16.mxu1 %v958_v8 }
  0xbc   : > { %865 = vmatprep.subr.bf16.mxu0 %v959_v9 }
  0xbe   : > { %846 = vmatpush3.bf16.msra.mxu1 %v958_v8 }
  0xbf   : > { %866 = vmatpush3.bf16.msra.mxu0 %v959_v9  ;;  %847 = vmatprep.subr.bf16.mxu1 %v960_v10 }
  0xc0   : > { %867 = vmatprep.subr.bf16.mxu0 %v961_v14 }
  0xc2   : > { %848 = vmatpush3.bf16.msra.mxu1 %v960_v10 }
  0xc3   : > { %868 = vmatpush3.bf16.msra.mxu0 %v961_v14  ;;  %849 = vmatprep.subr.bf16.mxu1 %v962_v18 }
  0xc4   : > { %869 = vmatprep.subr.bf16.mxu0 %v963_v19 }
  0xc6   : > { %850 = vmatpush3.bf16.msra.mxu1 %v962_v18 }
  0xc7   : > { %870 = vmatpush3.bf16.msra.mxu0 %v963_v19  ;;  %851 = vmatprep.subr.bf16.mxu1 %v964_v20 }
  0xc8   : > { %871 = vmatprep.subr.bf16.mxu0 %v965_v21 }
  0xca   : > { %852 = vmatpush3.bf16.msra.mxu1 %v964_v20 }
  0xcb   : > { %872 = vmatpush3.bf16.msra.mxu0 %v965_v21 }
  0xcd   : > { %854 = vmatmul.mubr.bf16.vlgmr.msra.gmra.mrb[0].mxu1 %v368_v26 }
  0xce   : > { %874 = vmatmul.mubr.bf16.vlgmr.msra.gmra.mrb[0].mxu0 %v350_v27 }
 0x1a0   : > { %v855_v28 = vpop.f32.mrb[0].mxu1 }
 0x1a1   : > { %v875_v29 = vpop.f32.mrb[0].mxu0  ;;  %v467_v31 = vpop.f32.mrb[1].mxu1 }
 0x1a2   : > { %v573_v32 = vadd.f32 %v875_v29, %v855_v28  ;;  %v564_v33 = vpop.f32.mrb[1].mxu0  ;;  %v856_v34 = vpop.f32.mrb[2].mxu1 }
 0x1a3   : > { %v565_v35 = vadd.f32 %v564_v33, %v467_v31  ;;  %v876_v36 = vpop.f32.mrb[2].mxu0  ;;  %v470_v37 = vpop.f32.mrb[3].mxu1 }
 0x1a4   : > { %v583_v38 = vadd.f32 %v580_v30, %v573_v32  ;;  %v576_v39 = vadd.f32 %v876_v36, %v856_v34  ;;  %v567_v40 = vpop.f32.mrb[3].mxu0 }
 0x1a5   : > { %v581_v41 = vadd.f32 %v580_v30, %v565_v35  ;;  %v568_v42 = vadd.f32 %v567_v40, %v470_v37 }
 0x1a6   : > { %v803_v43 = vmul.f32 -1.442695, %v583_v38  ;;  %v584_v44 = vadd.f32 %v580_v30, %v576_v39 }
 0x1a7   : > { %v801_v45 = vmul.f32 -1.442695, %v581_v41  ;;  %v582_v46 = vadd.f32 %v580_v30, %v568_v42 }
 0x1a8   : > { %966 = vpow2.f32 %v803_v43  ;;  %v804_v47 = vmul.f32 -1.442695, %v584_v44 }
 0x1a9   : > { %968 = vpow2.f32 %v801_v45  ;;  %v802_v48 = vmul.f32 -1.442695, %v582_v46 }
 0x1aa   : > { %970 = vpow2.f32 %v804_v47 }
 0x1ab   : > { %972 = vpow2.f32 %v802_v48 }
 0x1b2   : > { %v967_v49 = vpop.eup %966 }
 0x1b3   : > { %v969_v50 = vpop.eup %968  ;;  %v599_v51 = vadd.f32 1.0, %v967_v49 }
 0x1b4   : > { %v971_v52 = vpop.eup %970  ;;  %v597_v53 = vadd.f32 1.0, %v969_v50 }
 0x1b5   : > { %v973_v54 = vpop.eup %972  ;;  %974 = vrcp.f32 %v599_v51  ;;  %v600_v55 = vadd.f32 1.0, %v971_v52 }
 0x1b6   : > { %976 = vrcp.f32 %v597_v53  ;;  %v598_v56 = vadd.f32 1.0, %v973_v54 }
 0x1b7   : > { %978 = vrcp.f32 %v600_v55 }
 0x1b8   : > { %980 = vrcp.f32 %v598_v56 }
 0x1bf   : > { %v975_v60 = vpop.eup %974 }
 0x1c0   : > { %v977_v62 = vpop.eup %976  ;;  %v615_v63 = vmul.f32 %v975_v60, %v611_v57 }
 0x1c1   : > { %v979_v0 = vpop.eup %978  ;;  %v613_v1 = vmul.f32 %v977_v62, %v609_v58  ;;  %632 = sbr.rel (!%p1582_p0) target bundleno = 484 (0x1e4), region = 60 }
 0x1c2   : > { %v981_v2 = vpop.eup %980  ;;  %v619_v3 = vadd.f32 %v615_v63, %v347_v22  ;;  %v616_v4 = vmul.f32 %v979_v0, %v612_v59 }
 0x1c3   : > { %v617_v5 = vadd.f32 %v613_v1, %v1466_v11  ;;  %v614_v6 = vmul.f32 %v981_v2, %v610_v61 }
 0x1c4   : > { %623 = vst [vmem:[%s324_s12 + $0x10] sm:$0xff] %v619_v3  ;;  %v620_v7 = vadd.f32 %v616_v4, %v1483_v23 }
 0x1c5   : > { %621 = vst [vmem:[%s324_s12] sm:$0xff] %v617_v5  ;;  %v618_v8 = vadd.f32 %v614_v6, %v1469_v12 }
 0x1c6   : > { %624 = vst [vmem:[%s324_s12 + $0x18] sm:$0xff] %v620_v7 }
 0x1c7   : > { %622 = vst [vmem:[%s324_s12 + $0x8] sm:$0xff] %v618_v8 }
 0x1c8   : > { %s1593_s24 = smov (!%p635_p12, %s634_s24), 4 }
 0x1c9   : > { %s1501_s11 = sshll.u32 %s1593_s24, 7 }
 0x1ca   : > { %s639_s29 = ssub.s32 512, %s1501_s11 }
 0x1cb   : > { %640 = vsyncadd %s626_s14, %s639_s29  ;;  %p808_p7 = scmp.ne.s32.totalorder %s1501_s11, 0  ;;  %s816_s27 = sshll.u32 %s1241_s0, 9 }
 0x1cc   : > { %s1511_s15 = scalar_lea.hbm %s1564_s5, %s816_s27  ;;  %s645_s17 = sshll.u32 %s324_s12, 4  ;;  %s1513_s17 = int_to_ptr.vmem [resolvable:$true] %s645_s17 }
 0x1cd   : > { %s1094_s18 = scalar_lea.vmem %s1513_s17, %s1501_s11  ;;  %s1184_s13 = smov [#allocation11]  }
 0x1ce   : > { %p1095_p8 = scmp.ne.s32.totalorder %s1513_s17, %s1094_s18  ;;  %s1098_s8 = sshll.u32 %s1184_s13, 4  ;;  %s1099_s8 = int_to_ptr.vmem [resolvable:$false] %s1098_s8 }
 0x1cf   : > { %s1100_s0 = scalar_lea.vmem %s1099_s8, 1024  ;;  %p1101_p3 = scmp.lt.s32.totalorder %s1513_s17, %s1099_s8 }
 0x1d0   : > { %p1096_p9 = pnand %p1095_p8, %p808_p7  ;;  %p1102_p10 = scmp.lt.s32.totalorder %s1100_s0, %s1094_s18 }
 0x1d2   : > { %p1097_p1 = pneg %p1096_p9  ;;  %p1103_p5 = por %p1102_p10, %p1101_p3 }
 0x1d4   : > { %p1104_p2 = pnand %p1103_p5, %p1097_p1 }
 0x1d6   : > { %1107 = shalt.err (!%p1104_p2)
}
 0x1d7   : > { %s1108_s19 = scalar_lea.hbm %s1511_s15, %s1501_s11  ;;  %s1112_s12 = scalar_lea.hbm %s1564_s5, 896 }
 0x1d8   : > { %p1109_p6 = scmp.ne.s32.totalorder %s1511_s15, %s1108_s19  ;;  %p1113_p0 = scmp.lt.u32.totalorder %s1511_s15, %s1564_s5 }
 0x1d9   : > { %p1114_p12 = scmp.lt.u32.totalorder %s1112_s12, %s1108_s19  ;;  %p1116_p9 = scmp.lt.u32.totalorder %s1108_s19, %s1511_s15 }
 0x1da   : > { %p1110_p11 = pnand %p1109_p6, %p808_p7 }
 0x1db   : > { %p1115_p8 = por %p1114_p12, %p1113_p0 }
 0x1dc   : > { %p1111_p13 = pneg %p1110_p11 }
 0x1dd   : > { %p1117_p1 = por %p1116_p9, %p1115_p8 }
 0x1df   : > { %p1118_p3 = pnand %p1117_p1, %p1111_p13 }
 0x1e1   : > { %1121 = shalt.err (!%p1118_p3)
}
 0x1e2   : > { %s1185_s29 = smov 128   ;;  %s1186_s27 = smov 8  }
 0x1e3   : > { %651 = dma.vmem_to_hbm [thread:$0]  (%p808_p7), %s1513_s17, %s1501_s11, %s1511_s15, %s626_s14, %s1185_s29, %s1185_s29, %s1186_s27  }
 0x1e4 PF: > { %s660_s6 = sand.u32 1, %s1160_s20   ;;  %p1583_p10 = scmp.ne.s32.totalorder %s1571_s7, 0 }
 0x1e5   : > { %s661_s10 = scalar_lea.sflag [#allocation5], %s660_s6 }
 0x1e6   : > { %p900_p5 = pnand %p764_p4, %p1583_p10 }
 0x1e8   : > { %1155 = dma.done.wait (!%p900_p5), %s661_s10, 512  }
 0x1e9   : > { %1157 = vsyncadd (!%p900_p5), %s661_s10, 4294966784  ;;  %p23_p2 = scmp.ge.s32.totalorder %s1245_s25, 4   ;;  %s1584_s20 = smov %s1164_s21 }
 0x1ea   : > { %s1585_s21 = smov %s1168_s22  ;;  %s1586_s22 = smov %s1257_s28 }
 0x1eb   : > { %s1587_s23 = smov %s1245_s25  ;;  %25 = sbr.rel (!%p23_p2) target bundleno = 10 (0xa), region = 106 }
 0x1f2   :  { %666 = vsyncpa [#allocation4], 1 }
 0x1f3   :  { %668 = vsyncpa [#allocation4 + $0x1], 1 }
 0x1f4   :  { %669 = vsyncpa [#allocation7], 1 }
 0x1f5   :  { %671 = vsyncpa [#allocation7 + $0x1], 1 }
 0x1f6   :  { %672 = vsyncpa [#allocation10], 1 }
 0x1f7   :  { %673 = vsyncpa [#allocation5], 1 }
 0x1f8   :  { %675 = vsyncpa [#allocation5 + $0x1], 1 }

</bundles_post_ra>
